<compile_context>
chip_gen: v5e
topology: v5e:2x2
jax: 0.10.0
libtpu: 0.0.40
codegen_flags: <defaults>
</compile_context>

<pallas_src>
from functools import partial

import numpy as np
import jax
import jax.numpy as jnp
from jax.experimental import pallas as pl
from jax.experimental.pallas import tpu as pltpu

_LANES = 128
_ROW_ALIGN = 16          # multiple of 16 rows: valid sublane tiling for f32 and bf16
_MAX_BLOCK_ROWS = 2048   # 2048 * 128 * 4 B = 1 MiB per operand per block


def _ema_kernel(coeff_ref, mf_ref, x_ref, o_ref):
    # coeff_ref: SMEM (2,) f32 = [1 - alpha, alpha]
    # mf_ref / x_ref / o_ref: VMEM (block_rows, 128) tiles of the flattened field.
    keep = coeff_ref[0]
    gain = coeff_ref[1]
    mf = mf_ref[...].astype(jnp.float32)   # cast hoisted: one pass per operand
    xv = x_ref[...].astype(jnp.float32)
    o_ref[...] = (keep * mf + gain * xv).astype(o_ref.dtype)


def _round_up(n, m):
    return -(-n // m) * m


def _tiling_plan(rows):
    """Pick (block_rows, dimension_semantics) for the row-tile grid axis."""
    block_rows = min(rows, _MAX_BLOCK_ROWS)
    semantics = pltpu.PARALLEL
    try:
        kind = jax.devices()[0].device_kind.lower()
    except Exception:  # pragma: no cover - defensive
        kind = ""
    is_v7 = ("v7" in kind) or ("7x" in kind)
    if is_v7:
        # Ensure >= 2 grid steps so CORE_PARALLEL can shard rows across the 2 TCs.
        if rows <= _MAX_BLOCK_ROWS and rows >= 2 * _ROW_ALIGN:
            block_rows = _round_up(-(-rows // 2), _ROW_ALIGN)
        if pl.cdiv(rows, block_rows) >= 2:
            semantics = pltpu.CORE_PARALLEL
    return block_rows, semantics


@partial(jax.jit, donate_argnums=(0,))
def _mean_tracker_update(mf2, x, prop_contribution, lambda_rate):
    """One EMA step on the padded (rows, 128) master copy; mean_field updated in place."""
    rows, cols = mf2.shape
    assert cols == _LANES

    # Flatten + zero-pad x to the same lane-dense slab (no-op pad when already aligned).
    total = int(np.prod(x.shape))
    xf = x.reshape(-1)
    pad = rows * cols - total
    if pad:
        xf = jnp.pad(xf, (0, pad))
    x2 = xf.reshape(rows, cols)

    # EMA coefficients as two SMEM scalars (traced, so no recompiles for new values).
    alpha = jnp.asarray(prop_contribution, jnp.float32) * (
        1.0 - jnp.asarray(lambda_rate, jnp.float32))
    coeffs = jnp.stack([1.0 - alpha, alpha])

    block_rows, semantics = _tiling_plan(rows)
    grid = (pl.cdiv(rows, block_rows),)

    return pl.pallas_call(
        _ema_kernel,
        out_shape=jax.ShapeDtypeStruct((rows, cols), mf2.dtype),
        grid_spec=pltpu.PrefetchScalarGridSpec(
            num_scalar_prefetch=0,
            grid=grid,
            in_specs=[
                pl.BlockSpec(memory_space=pltpu.MemorySpace.SMEM),    # [keep, gain]
                pl.BlockSpec((block_rows, cols), lambda i: (i, 0)),   # mean_field
                pl.BlockSpec((block_rows, cols), lambda i: (i, 0)),   # x
            ],
            out_specs=pl.BlockSpec((block_rows, cols), lambda i: (i, 0)),
        ),
        input_output_aliases={1: 0},  # reuse mean_field's HBM buffer for the output
        compiler_params=pltpu.CompilerParams(dimension_semantics=(semantics,)),
    )(coeffs, mf2, x2)


class MeanTracker:
    """JAX/Pallas port of the PyTorch MeanTracker module (tracks a mean vector field)."""

    def __init__(self, img_dims, nb_dims, mean_field_idx, lambda_rate=0.9,
                 dtype=jnp.float32):
        assert len(img_dims) == nb_dims
        assert nb_dims in (2, 3), "image dims must be 2 or 3"
        self.img_dims = tuple(img_dims)
        self.nb_dims = nb_dims
        self.mean_field_idx = mean_field_idx
        self.lambda_rate = float(lambda_rate)
        self.dtype = dtype
        self._shape = (nb_dims, *self.img_dims)
        self._total = int(np.prod(self._shape))
        self._rows = _round_up(-(-self._total // _LANES), _ROW_ALIGN)
        # Persistent, lane-dense, padded master copy of the mean field (kept padded).
        self._mean_field2d = jnp.zeros((self._rows, _LANES), dtype=dtype)
        # TODO(synk): these counters exist on the PyTorch module but its forward never
        # updates them; mirrored here as inert state.
        self.weight_accumulator = 0.0
        self.applied_weight_accumulator = 0.0
        self.mean_field_mag = 0.0

    def __call__(self, x, prop_contribution):
        assert 0.0 <= prop_contribution <= 1.0, (
            "prop_contribution must be greater than 0 and less than or equal to 1")
        assert tuple(x.shape) == self._shape
        self._mean_field2d = _mean_tracker_update(
            self._mean_field2d, x, prop_contribution, self.lambda_rate)

    forward = __call__

    @property
    def mean_field(self):
        return self.get_mean_field()

    def get_mean_field(self):
        flat = self._mean_field2d.reshape(-1)[: self._total]
        return flat.reshape(self._shape)


def _numpy_ref_steps(shape, steps, lambda_rate):
    mf = np.zeros(shape, dtype=np.float32)
    for p, xv in steps:
        a = p * (1.0 - lambda_rate)
        mf = (1.0 - a) * mf + a * np.asarray(xv)
    return mf


if __name__ == "__main__":
    key = jax.random.PRNGKey(0)
    lambda_rate = 0.9

    # Case 1: small 2-D field, lane-aligned total (2 * 16 * 16 = 512).
    nb_dims, img_dims = 2, (16, 16)
    tracker = MeanTracker(img_dims, nb_dims, mean_field_idx=0, lambda_rate=lambda_rate)
    key, k1, k2 = jax.random.split(key, 3)
    x1 = jax.random.normal(k1, (nb_dims, *img_dims), dtype=jnp.float32)
    x2 = jax.random.normal(k2, (nb_dims, *img_dims), dtype=jnp.float32)
    tracker(x1, 0.5)
    tracker(x2, 1.0)
    out = jax.block_until_ready(tracker.get_mean_field())
    ref = _numpy_ref_steps((nb_dims, *img_dims),
                           [(0.5, x1), (1.0, x2)], lambda_rate)
    assert out.shape == (nb_dims, *img_dims)
    np.testing.assert_allclose(np.asarray(out), ref, rtol=1e-6, atol=1e-6)

    # Case 2: small 3-D field with a total NOT divisible by 128 (exercises padded tail).
    nb_dims3, img_dims3 = 3, (5, 7, 9)
    tracker3 = MeanTracker(img_dims3, nb_dims3, mean_field_idx=1, lambda_rate=lambda_rate)
    key, k3, k4 = jax.random.split(key, 3)
    y1 = jax.random.normal(k3, (nb_dims3, *img_dims3), dtype=jnp.float32)
    y2 = jax.random.normal(k4, (nb_dims3, *img_dims3), dtype=jnp.float32)
    tracker3(y1, 0.25)
    tracker3(y2, 0.75)
    out3 = jax.block_until_ready(tracker3.get_mean_field())
    ref3 = _numpy_ref_steps((nb_dims3, *img_dims3),
                            [(0.25, y1), (0.75, y2)], lambda_rate)
    assert out3.shape == (nb_dims3, *img_dims3)
    np.testing.assert_allclose(np.asarray(out3), ref3, rtol=1e-6, atol=1e-6)

    print("KERNEL_OK")
</pallas_src>

<mosaic_0001>
module attributes {stable_mosaic.version = 11 : i64} {
  func.func @_ema_kernel(%arg0: i32, %arg1: memref<2xf32, #tpu.memory_space<smem>>, %arg2: memref<16x128xf32, #tpu.memory_space<vmem>>, %arg3: memref<16x128xf32, #tpu.memory_space<vmem>>, %arg4: memref<16x128xf32, #tpu.memory_space<vmem>>) attributes {dimension_semantics = [#tpu.dimension_semantics<parallel>], iteration_bounds = array<i64: 1>, scalar_prefetch = 0 : i64, scratch_operands = 0 : i64, tpu.core_type = #tpu.core_type<tc>, window_params = [{transform_indices = @transform_0, window_bounds = array<i64: 2>}, {transform_indices = @transform_1, window_bounds = array<i64: 16, 128>}, {transform_indices = @transform_2, window_bounds = array<i64: 16, 128>}, {transform_indices = @transform_3, window_bounds = array<i64: 16, 128>}]} {
    %c0 = arith.constant 0 : index
    %0 = memref.load %arg1[%c0] : memref<2xf32, #tpu.memory_space<smem>>
    %c1 = arith.constant 1 : index
    %1 = memref.load %arg1[%c1] : memref<2xf32, #tpu.memory_space<smem>>
    %c0_0 = arith.constant 0 : index
    %c0_1 = arith.constant 0 : index
    %2 = vector.load %arg2[%c0_0, %c0_1] : memref<16x128xf32, #tpu.memory_space<vmem>>, vector<16x128xf32>
    %c0_2 = arith.constant 0 : index
    %c0_3 = arith.constant 0 : index
    %3 = vector.load %arg3[%c0_2, %c0_3] : memref<16x128xf32, #tpu.memory_space<vmem>>, vector<16x128xf32>
    %4 = vector.broadcast %0 : f32 to vector<16x128xf32>
    %5 = arith.mulf %4, %2 : vector<16x128xf32>
    %6 = vector.broadcast %1 : f32 to vector<16x128xf32>
    %7 = arith.mulf %6, %3 : vector<16x128xf32>
    %8 = arith.addf %5, %7 : vector<16x128xf32>
    %c0_4 = arith.constant 0 : index
    %c0_5 = arith.constant 0 : index
    %9 = vector.load %arg4[%c0_4, %c0_5] : memref<16x128xf32, #tpu.memory_space<vmem>>, vector<16x128xf32>
    tpu.vector_store %arg4[%c0_4, %c0_5], %8 {strides = array<i32>} : memref<16x128xf32, #tpu.memory_space<vmem>>, vector<16x128xf32>,
    return
  }
  func.func @transform_0(%arg0: i32) -> i32 {
    %c0_i32 = arith.constant 0 : i32
    %c0_i32_0 = arith.constant 0 : i32
    return %c0_i32 : i32
  }
  func.func @transform_1(%arg0: i32) -> (i32, i32) {
    %c0_i32 = arith.constant 0 : i32
    %c0_i32_0 = arith.constant 0 : i32
    return %arg0, %c0_i32 : i32, i32
  }
  func.func @transform_2(%arg0: i32) -> (i32, i32) {
    %c0_i32 = arith.constant 0 : i32
    %c0_i32_0 = arith.constant 0 : i32
    return %arg0, %c0_i32 : i32, i32
  }
  func.func @transform_3(%arg0: i32) -> (i32, i32) {
    %c0_i32 = arith.constant 0 : i32
    %c0_i32_0 = arith.constant 0 : i32
    return %arg0, %c0_i32 : i32, i32
  }
}

</mosaic_0001>

<bundles_post_ra>
// kernel: _mean_tracker_update.1
= control target key start
LH: loop header
LB: loop body
LE: loop exit
PB: predicated region body
PF: predicated region fallthrough
CT: control target
= control target key end

     0   :  { %8 = vsyncpa [#allocation5], 0  ;;  %s198_s0 = inlined_call_operand.vmem [shape: f32[2], index: 0, kind: input, shape index: {}]   ;;  %s199_s1 = inlined_call_operand.hbm [shape: f32[16,128], index: 1, kind: input, shape index: {}, may-alias: {1,3}]   ;;  %s200_s2 = inlined_call_operand.vmem [shape: f32[16,128], index: 2, kind: input, shape index: {}]   ;;  %s201_s3 = inlined_call_operand.hbm [shape: f32[16,128], index: 3, kind: output, shape index: {}, may-alias: {1,3}]  }
   0x1   :  { %9 = vsyncpa [#allocation3], 0 }
   0x2   :  { %10 = vsyncpa [#allocation4], 0  ;;  %s16_s14 = sshll.u32 %s198_s0, 4  ;;  %s24_s17 = sshll.u32 %s199_s1, 4  ;;  %s17_s14 = int_to_ptr.vmem [resolvable:$true] %s16_s14  ;;  %s25_s17 = int_to_ptr.hbm [resolvable:$true] %s24_s17 }
   0x3   :  { %s152_s18 = smov [#allocation2]   ;;  %s153_s19 = smov [#allocation6]  }
   0x4   :  { %19 = dma.vmem_to_smem %s17_s14, 16, %s152_s18, [#allocation5]  }
   0x5   :  { %s26_s20 = sshll.u32 %s153_s19, 4  ;;  %s154_s21 = smov 128   ;;  %s27_s20 = int_to_ptr.vmem [resolvable:$true] %s26_s20 }
   0x6   :  { %s155_s22 = smov 8  }
   0x7   :  { %32 = dma.hbm_to_vmem [thread:$0]  %s25_s17, 256, %s27_s20, [#allocation3], %s154_s21, %s154_s21, %s155_s22  }
   0x8   :  { %146 = dma.done.wait [#allocation5], 16  }
   0x9   :  { %147 = vsyncadd [#allocation5], 4294967280 }
   0xa   :  { %148 = dma.done.wait [#allocation3], 256  }
   0xb   :  { %149 = vsyncadd [#allocation3], 4294967040 }
   0xc   :  { %43 = sfence }
   0xd   :  { %s44_s0 = sld [smem:[#allocation2]]  ;;  %v46_v0 = vld [vmem:[#allocation6] sm:$0xff]  ;;  %v47_v1 = vld [vmem:[#allocation6 + $0x8] sm:$0xff]  ;;  %s156_s27 = smov [#allocation7]  }
   0xe   :  { %s80_s23 = sld [smem:[#allocation2 + $0x1]]  ;;  %v48_v2 = vld [vmem:[%s200_s2] sm:$0xff]  ;;  %v49_v3 = vld [vmem:[%s200_s2 + $0x8] sm:$0xff]  ;;  %s64_s28 = sshll.u32 %s156_s27, 4  ;;  %s65_s28 = int_to_ptr.vmem [resolvable:$true] %s64_s28 }
   0xf   :  { %s66_s4 = sshll.u32 %s201_s3, 4  ;;  %s67_s4 = int_to_ptr.hbm [resolvable:$true] %s66_s4 }
  0x13   :  { %v50_v4 = vstv %s44_s0 }
  0x14   :  { %v51_v5 = vmul.f32 %v50_v4, %v46_v0  ;;  %v53_v6 = vstv %s80_s23  ;;  %v52_v7 = vmul.f32 %v50_v4, %v47_v1 }
  0x15   :  { %v54_v8 = vmul.f32 %v53_v6, %v48_v2  ;;  %v55_v9 = vmul.f32 %v53_v6, %v49_v3 }
  0x17   :  { %v56_v10 = vadd.f32 %v54_v8, %v51_v5  ;;  %v57_v11 = vadd.f32 %v55_v9, %v52_v7 }
  0x19   :  { %58 = vst [vmem:[#allocation7] sm:$0xff] %v56_v10 }
  0x1a   :  { %59 = vst [vmem:[#allocation7 + $0x8] sm:$0xff] %v57_v11 }
  0x1b   :  { %72 = dma.vmem_to_hbm [thread:$0]  %s65_s28, 256, %s67_s4, [#allocation4], %s154_s21, %s154_s21, %s155_s22  }
  0x1c   :  { %150 = dma.done.wait [#allocation4], 256  }
  0x1d   :  { %151 = vsyncadd [#allocation4], 4294967040 }
  0x1e   :  { %77 = vsyncpa [#allocation3], 1 }
  0x1f   :  { %78 = vsyncpa [#allocation4], 1 }
  0x20   :  { %79 = vsyncpa [#allocation5], 1 }

</bundles_post_ra>
